<compile_context>
chip_gen: v5e
topology: v5e:2x2
jax: 0.10.0
libtpu: 0.0.40
codegen_flags: <defaults>
</compile_context>

<pallas_src>
import functools

import jax
import jax.numpy as jnp
from jax import lax
from jax.experimental import pallas as pl
from jax.experimental.pallas import tpu as pltpu

_SUB = 8     # sublane granularity
_LANE = 128  # lane granularity


def _cdiv(a, b):
    return -(-a // b)


def _round_up(v, m):
    return ((v + m - 1) // m) * m


def _tile_budget_bytes():
    """Per-x-tile VMEM budget (the pipeline double-buffers it), per TPU generation."""
    kind = ""
    try:
        kind = jax.devices()[0].device_kind.lower()
    except Exception:
        pass
    if "v7" in kind:
        return 14 << 20   # 64 MiB physical VMEM: 2 x 14 MiB buffers + headroom
    if "v6" in kind:
        return 12 << 20   # 128 MiB physical; >= 8 MiB tiles sit at the HBM roofline
    return 4 << 20        # v5e (16 MiB default scoped VMEM) / conservative default


def _choose_tiles(R, hw, itemsize, budget):
    """Pick (rows_t, hw_t): rows_t multiple of 8 (or == R); hw_t multiple of 128
    (or == hw); rows_t * hw_t * itemsize <= budget whenever achievable."""
    min_rows = R if R < _SUB else _SUB
    if min_rows * hw * itemsize <= budget:
        # Whole spatial extent fits in a minimal row stripe -> tile over rows only.
        if R <= _SUB:
            return R, hw
        rows_by_budget = max(_SUB, (budget // (hw * itemsize)) // _SUB * _SUB)
        rows_half = _round_up((R + 1) // 2, _SUB)   # < R when R > 8 -> >= 2 row blocks
        return max(_SUB, min(rows_by_budget, rows_half)), hw
    # Spatial extent too large even for an 8-row stripe -> cdiv-tile hw (128-aligned).
    lanes = max(_LANE, (budget // (min_rows * itemsize)) // _LANE * _LANE)
    return min_rows, min(hw, lanes)


def _pool_kernel(x_ref, out_ref, sum_acc, max_acc, *, hw, hw_t, hw_grid, needs_mask):
    """Grid = (row_block [parallel], hw_split [parallel], hw_block [arbitrary]).

    x_ref   : (rows_t, hw_t) tile of the (B*C, H*W) view, native dtype
    out_ref : (1, rows_t, 2) per-row [spatial_sum, spatial_max] for this split
    sum_acc : (<=8, 1) f32 running sum   (only used when hw_grid > 1)
    max_acc : (<=8, 1) f32 running max   (only used when hw_grid > 1)
    """
    h = pl.program_id(2)
    x = x_ref[...].astype(jnp.float32)   # per-tile cast; HBM read stays in x's dtype

    if needs_mask:
        # cdiv spatial tiling: mask the ragged tail (and any fully padded trailing
        # block of the second parallel split): 0 for the sum, -inf for the max.
        base = (pl.program_id(1) * hw_grid + h) * hw_t
        lane = lax.broadcasted_iota(jnp.int32, x.shape, 1)
        valid = (lane + base) < hw
        xs = jnp.where(valid, x, 0.0)
        xm = jnp.where(valid, x, -jnp.inf)
    else:
        xs, xm = x, x

    s = jnp.sum(xs, axis=-1, keepdims=True)    # (rows_t, 1)
    m = jnp.max(xm, axis=-1, keepdims=True)    # (rows_t, 1)

    if hw_grid == 1:
        # Common case: whole spatial extent of this split in a single step -> the
        # cross-lane reduce runs exactly once per row; no per-step XLU/relayout
        # work competes with the DMA stream.
        out_ref[...] = jnp.concatenate([s, m], axis=-1)[None, :, :]
    else:
        # Rare huge-spatial case (rows_t <= 8): accumulate across hw blocks.
        @pl.when(h == 0)
        def _init():
            sum_acc[...] = jnp.zeros_like(sum_acc)
            max_acc[...] = jnp.full_like(max_acc, -jnp.inf)

        sum_acc[...] = sum_acc[...] + s
        max_acc[...] = jnp.maximum(max_acc[...], m)

        @pl.when(h == hw_grid - 1)
        def _finalize():
            out_ref[...] = jnp.concatenate(
                [sum_acc[...], max_acc[...]], axis=-1)[None, :, :]


def channel_mask_unit_forward(x_nchw, weight, bias, prev_mask, gumbel_temp,
                              tile_budget_bytes=None):
    """ChannelMaskUnit(x, prev_mask, meta) forward, reduction=0, gumbel_noise=False.

    x_nchw : (B, Cin, H, W) feature map (any float dtype, consumed natively)
    weight : (Cout, Cin, 1, 1) 1x1 conv weight
    bias   : (Cout,)           1x1 conv bias
    prev_mask : scalar hard_prev (non-ChannelMask branch of ChannelMask)
    """
    B, C, H, W = x_nchw.shape
    Cout = weight.shape[0]
    hw = H * W
    R = B * C

    x2d = x_nchw.reshape(R, hw)                  # free reshape of NCHW, native dtype
    itemsize = x2d.dtype.itemsize
    budget = _tile_budget_bytes() if tile_budget_bytes is None else tile_budget_bytes

    rows_t, hw_t = _choose_tiles(R, hw, itemsize, budget)
    rows_grid = _cdiv(R, rows_t)
    hw_blocks = _cdiv(hw, hw_t)

    # Degenerate single-tile grid on a big map: split the spatial axis so the
    # pipeline / second TensorCore has >= 2 blocks to work with.
    if (rows_grid == 1 and hw_blocks == 1 and hw >= 2 * _LANE
            and rows_t * hw_t * itemsize >= (2 << 20)):
        hw_t = max(_LANE, _round_up(_cdiv(hw, 2), _LANE))
        hw_blocks = _cdiv(hw, hw_t)

    # Keep both v7x TensorCores streaming when the row axis is degenerate: split the
    # hw blocks into two parallel halves emitting independent partial (sum, max).
    P = 2 if (rows_grid == 1 and hw_blocks >= 2) else 1
    hw_grid = _cdiv(hw_blocks, P)
    needs_mask = P * hw_grid * hw_t > hw

    if P * hw_grid > hw_blocks:
        # Odd hw_blocks with P=2: clamp the trailing (fully masked) block index so it
        # never addresses past the array; its contribution is masked to 0/-inf anyway.
        last = hw_blocks - 1
        x_index_map = lambda r, p, h: (r, jnp.minimum(p * hw_grid + h, last))
    else:
        x_index_map = lambda r, p, h: (r, p * hw_grid + h)

    acc_rows = min(rows_t, _SUB)   # scratch only used when hw_grid > 1 (rows_t <= 8)
    tile_bytes = rows_t * hw_t * itemsize
    vmem_limit = int(2 * tile_bytes) + (16 << 20)

    kernel = functools.partial(_pool_kernel, hw=hw, hw_t=hw_t, hw_grid=hw_grid,
                               needs_mask=needs_mask)

    parts = pl.pallas_call(
        kernel,
        out_shape=jax.ShapeDtypeStruct((P, R, 2), jnp.float32),
        grid=(rows_grid, P, hw_grid),
        in_specs=[
            # TODO(synk): sweep pipeline_mode=pl.Buffered(3) here on v7x.
            pl.BlockSpec((rows_t, hw_t), x_index_map),
        ],
        out_specs=pl.BlockSpec((1, rows_t, 2), lambda r, p, h: (p, r, 0)),
        scratch_shapes=[
            pltpu.VMEM((acc_rows, 1), jnp.float32),   # running spatial sum
            pltpu.VMEM((acc_rows, 1), jnp.float32),   # running spatial max
        ],
        compiler_params=pltpu.CompilerParams(
            dimension_semantics=("parallel", "parallel", "arbitrary"),
            vmem_limit_bytes=vmem_limit),
    )(x2d)

    # Combine the parallel-split partials and fold the two 1x1 convs (linear) into
    # one tiny matmul:  conv1(avg) + conv1(max) == (avg + max) @ W^T + 2*b.
    sums = jnp.sum(parts[..., 0], axis=0)                 # (R,) total spatial sum
    maxs = jnp.max(parts[..., 1], axis=0)                 # (R,) total spatial max
    pooled = (sums * (1.0 / hw) + maxs).reshape(B, C).astype(jnp.float32)

    wt = weight.reshape(Cout, C).T.astype(jnp.float32)    # (C, Cout)
    soft = pooled @ wt + 2.0 * bias.astype(jnp.float32)   # (B, Cout)
    # Gumbel straight-through, gumbel_noise=False deterministic path.
    hard = (jax.nn.sigmoid(soft / gumbel_temp) >= 0.5).astype(jnp.float32)

    channel_soft = soft.reshape(B, Cout, 1, 1)
    channel_hard = hard.reshape(B, Cout, 1, 1)

    # ChannelMask bookkeeping (hard_prev is a plain scalar -> else branch).
    channel_inte_state = jnp.sum(channel_hard, axis=(1, 2, 3)) * prev_mask   # (B,)
    active_channels = jnp.sum(channel_hard) * prev_mask                      # scalar
    total_channels = channel_hard.size * prev_mask                           # scalar

    # TODO(synk): gumbel_noise=True (stochastic Gumbel sampling) and the
    # straight-through gradient are not implemented (forward-only kernel).
    return {
        "hard": channel_hard,
        "soft": channel_soft,
        "channel_inte_state": channel_inte_state,
        "active_channels": active_channels,
        "total_channels": total_channels,
    }


def _reference_forward(x, weight, bias, gumbel_temp):
    """Pure-JAX reference of ChannelAttention(ratio=0) + Gumbel(noise=False)."""
    B, C, H, W = x.shape
    Cout = weight.shape[0]
    w2 = weight.reshape(Cout, C).astype(jnp.float32)
    xf = x.astype(jnp.float32)
    avg = jnp.mean(xf, axis=(2, 3))                       # (B, C)
    mx = jnp.max(xf, axis=(2, 3))                         # (B, C)
    soft = (avg @ w2.T + bias) + (mx @ w2.T + bias)
    hard = (jax.nn.sigmoid(soft / gumbel_temp) >= 0.5).astype(jnp.float32)
    return soft.reshape(B, Cout, 1, 1), hard.reshape(B, Cout, 1, 1)


if __name__ == "__main__":
    key = jax.random.PRNGKey(0)

    # --- primary small example ---
    B, Cin, Cout, H, W = 2, 4, 4, 16, 16
    kx, kw, kb = jax.random.split(key, 3)
    x = jax.random.normal(kx, (B, Cin, H, W), dtype=jnp.float32)
    bound = float(Cin) ** -0.5
    weight = jax.random.uniform(kw, (Cout, Cin, 1, 1), jnp.float32, -bound, bound)
    bias = jax.random.uniform(kb, (Cout,), jnp.float32, -bound, bound)
    prev_mask = jnp.float32(1.0)
    meta = {"gumbel_temp": 1.0, "gumbel_noise": False}

    out = channel_mask_unit_forward(x, weight, bias, prev_mask, meta["gumbel_temp"])
    jax.block_until_ready(out["hard"])
    jax.block_until_ready(out["soft"])
    jax.block_until_ready(out["active_channels"])

    assert out["hard"].shape == (B, Cout, 1, 1)
    assert out["soft"].shape == (B, Cout, 1, 1)
    assert out["channel_inte_state"].shape == (B,)

    ref_soft, ref_hard = _reference_forward(x, weight, bias, meta["gumbel_temp"])
    assert jnp.allclose(out["soft"], ref_soft, atol=2e-5, rtol=1e-5), "soft mismatch"
    assert jnp.array_equal(out["hard"], ref_hard), "hard mismatch"

    # --- exercise the cdiv-tiled / masked / dual-parallel-split path with a tiny
    #     forced tile budget (even and odd hw block counts, ragged spatial tail) ---
    for (Hb, Wb) in ((20, 20), (20, 15)):
        xb = jax.random.normal(jax.random.PRNGKey(1), (1, 4, Hb, Wb), jnp.float32)
        outb = channel_mask_unit_forward(xb, weight, bias, prev_mask,
                                         meta["gumbel_temp"], tile_budget_bytes=2048)
        rs, rh = _reference_forward(xb, weight, bias, meta["gumbel_temp"])
        jax.block_until_ready(outb["soft"])
        assert jnp.allclose(outb["soft"], rs, atol=2e-5, rtol=1e-5), "tiled soft mismatch"
        assert jnp.array_equal(outb["hard"], rh), "tiled hard mismatch"

    print("KERNEL_OK")
</pallas_src>

<mosaic_0001>
module attributes {stable_mosaic.version = 11 : i64} {
  func.func @_pool_kernel(%arg0: i32, %arg1: i32, %arg2: i32, %arg3: memref<8x256xf32, #tpu.memory_space<vmem>>, %arg4: memref<1x8x2xf32, #tpu.memory_space<vmem>>, %arg5: memref<8x1xf32, #tpu.memory_space<vmem>>, %arg6: memref<8x1xf32, #tpu.memory_space<vmem>>) attributes {dimension_semantics = [#tpu.dimension_semantics<parallel>, #tpu.dimension_semantics<parallel>, #tpu.dimension_semantics<arbitrary>], iteration_bounds = array<i64: 1, 1, 1>, scalar_prefetch = 0 : i64, scratch_operands = 2 : i64, tpu.core_type = #tpu.core_type<tc>, window_params = [{transform_indices = @transform_0, window_bounds = array<i64: 8, 256>}, {transform_indices = @transform_1, window_bounds = array<i64: 1, 8, 2>}]} {
    %c0 = arith.constant 0 : index
    %c0_0 = arith.constant 0 : index
    %0 = vector.load %arg3[%c0, %c0_0] : memref<8x256xf32, #tpu.memory_space<vmem>>, vector<8x256xf32>
    %cst = arith.constant dense<0.000000e+00> : vector<8xf32>
    %1 = vector.multi_reduction <add>, %0, %cst [1] : vector<8x256xf32> to vector<8xf32>
    %2 = vector.shape_cast %1 : vector<8xf32> to vector<8x1xf32>
    %cst_1 = arith.constant dense<0xFF800000> : vector<8xf32>
    %3 = vector.multi_reduction <maximumf>, %0, %cst_1 [1] : vector<8x256xf32> to vector<8xf32>
    %4 = vector.shape_cast %3 : vector<8xf32> to vector<8x1xf32>
    %5 = tpu.concatenate %2, %4 in 1 : vector<8x1xf32>, vector<8x1xf32> -> vector<8x2xf32>
    %6 = vector.shape_cast %5 : vector<8x2xf32> to vector<1x8x2xf32>
    %c0_2 = arith.constant 0 : index
    %c0_3 = arith.constant 0 : index
    %c0_4 = arith.constant 0 : index
    %7 = vector.load %arg4[%c0_2, %c0_3, %c0_4] : memref<1x8x2xf32, #tpu.memory_space<vmem>>, vector<1x8x2xf32>
    tpu.vector_store %arg4[%c0_2, %c0_3, %c0_4], %6 {strides = array<i32>} : memref<1x8x2xf32, #tpu.memory_space<vmem>>, vector<1x8x2xf32>,
    return
  }
  func.func @transform_0(%arg0: i32, %arg1: i32, %arg2: i32) -> (i32, i32) {
    %c1_i32 = arith.constant 1 : i32
    %0 = arith.muli %arg1, %c1_i32 : i32
    %1 = arith.addi %0, %arg2 : i32
    %c0_i32 = arith.constant 0 : i32
    return %arg0, %1 : i32, i32
  }
  func.func @transform_1(%arg0: i32, %arg1: i32, %arg2: i32) -> (i32, i32, i32) {
    %c0_i32 = arith.constant 0 : i32
    %c0_i32_0 = arith.constant 0 : i32
    return %arg1, %arg0, %c0_i32 : i32, i32, i32
  }
}

</mosaic_0001>

<bundles_post_ra>
// kernel: tpu_custom_call.1
= control target key start
LH: loop header
LB: loop body
LE: loop exit
PB: predicated region body
PF: predicated region fallthrough
CT: control target
= control target key end

     0   :  { %6 = vsyncpa [#allocation5], 0  ;;  %s72_s9 = smov [#allocation4]   ;;  %s89_s0 = inlined_call_operand.hbm [shape: f32[8,256], index: 0, kind: input, shape index: {}]   ;;  %s90_s1 = inlined_call_operand.vmem [shape: f32[1,8,2], index: 1, kind: output, shape index: {}]  }
   0x1   :  { %s16_s8 = sshll.u32 %s89_s0, 4  ;;  %s18_s10 = sshll.u32 %s72_s9, 4  ;;  %s17_s8 = int_to_ptr.hbm [resolvable:$true] %s16_s8  ;;  %s19_s10 = int_to_ptr.vmem [resolvable:$true] %s18_s10 }
   0x2   :  { %21 = dma.hbm_to_vmem [thread:$0]  %s17_s8, 256, %s19_s10, [#allocation5]  }
   0x3   :  { %70 = dma.done.wait [#allocation5], 256  }
   0x4   :  { %71 = vsyncadd [#allocation5], 4294967040  ;;  %v28_v0 = vld [vmem:[#allocation4] sm:$0xff]  ;;  %v29_v1 = vld [vmem:[#allocation4 + $0x8] sm:$0xff]  ;;  %vm36_vm0 = vcmask 7168   ;;  %vm38_vm1 = vcmask 15360  }
   0x5   :  { %v30_v2 = vadd.f32 %v29_v1, %v28_v0  ;;  %v33_v3 = vmax.f32 %v28_v0, %v29_v1 }
   0x7   :  { %31 = vadd.xlane.f32.xlu0 %v30_v2 }
   0xf   :  { %34 = vmax.xlane.f32.xlu0 %v33_v3 }
  0x7a   :  { %v32_v4 = vpop.xlane.xlu0 %31 }
  0x82   :  { %v35_v5 = vpop.xlane.xlu0 %34 }
  0x83   :  { %v37_v6 = vsel %vm36_vm0, %v32_v4, %v35_v5 }
  0x84   :  { %39 = vst.msk [vmem:[%s90_s1] sm:$0xff] %vm38_vm1, %v37_v6 }
  0x85   :  { %44 = vsyncpa [#allocation5], 1 }

</bundles_post_ra>
